<compile_context>
chip_gen: v7x
topology: tpu7x:2x2x1
jax: 0.10.0
libtpu: 0.0.40
codegen_flags: <defaults>
</compile_context>

<pallas_src>
import functools

import jax
import jax.numpy as jnp
from jax import lax
from jax.experimental import pallas as pl
from jax.experimental.pallas import tpu as pltpu


def _leaky(v, slope=0.1):
    return jnp.where(v > 0, v, slope * v)


def _round_up(x, m):
    return ((x + m - 1) // m) * m


def temporal_block_kernel(x_ref, w1r_ref, w2_ref, b_ref, o_ref,
                          xwin_ref, h1_ref, *, TL, pad, K, dilation, nt):
    """One (batch, time-tile) grid step.

    x_ref   : (1, TL, Cin)            current input time tile (channels last)
    w1r_ref : (K*Cin, 2*Cout_p)       fused conv1 + residual-downsample weights
    w2_ref  : (K, Cout_p, Cout_p)     conv2 weights, one (Cout_p, Cout_p) per tap
    b_ref   : (3, Cout_p)             [b1; b2; bd] biases (f32)
    o_ref   : (1, TL, Cout_p)         output tile (compute dtype)
    xwin_ref: (pad+TL, Cin)           VMEM scratch: causal halo + current x tile
    h1_ref  : (pad+TL, Cout_p)        VMEM scratch: causal halo + current conv1 act
    """
    t = pl.program_id(1)
    cdt = xwin_ref.dtype
    cin = xwin_ref.shape[1]
    cout_p = h1_ref.shape[1]

    # Reset the causal halo only at the start of each batch element.
    if pad > 0:
        @pl.when(t == 0)
        def _():
            xwin_ref[0:pad, :] = jnp.zeros((pad, cin), cdt)
            h1_ref[0:pad, :] = jnp.zeros((pad, cout_p), cdt)

    # Stage current x tile right after the halo (base offset 0 keeps all K tap
    # reads starting at k*dilation, which is sublane-aligned whenever the
    # dilation is a multiple of the sublane pack).
    x_cur = x_ref[0].astype(cdt)                                   # (TL, Cin)
    if pad > 0:
        xwin_ref[pad:pad + TL, :] = x_cur

    # ---- conv1 + 1x1 residual fused into ONE MXU matmul ----
    # Last tap (k = K-1) of the window is exactly the live x tile.
    taps = [xwin_ref[k * dilation: k * dilation + TL, :] for k in range(K - 1)]
    xcat = jnp.concatenate(taps + [x_cur], axis=1) if K > 1 else x_cur
    hr = jnp.dot(xcat, w1r_ref[...], preferred_element_type=jnp.float32)
    h1 = _leaky(hr[:, :cout_p] + b_ref[0:1, :])                    # conv1 branch
    res = hr[:, cout_p:] + b_ref[2:3, :]                           # residual branch
    # TODO(synk): training-mode dropout (Bernoulli mask via pltpu PRNG) not implemented.

    h1_c = h1.astype(cdt)
    if pad > 0:
        h1_ref[pad:pad + TL, :] = h1_c

    # ---- conv2: sum of K accumulating dots over shifted h1 window slices ----
    # Last tap comes straight from the live value (no reload / no store->load dep).
    acc = jnp.dot(h1_c, w2_ref[K - 1], preferred_element_type=jnp.float32)
    for k in range(K - 1):
        acc += jnp.dot(h1_ref[k * dilation: k * dilation + TL, :], w2_ref[k],
                       preferred_element_type=jnp.float32)
    h2 = _leaky(acc + b_ref[1:2, :])

    # ---- residual add + final LeakyReLU ----
    o_ref[0] = _leaky(h2 + res).astype(o_ref.dtype)

    # Carry the last `pad` rows of this tile as the next tile's causal halo.
    if pad > 0 and nt > 1:
        @pl.when(t != nt - 1)
        def _():
            xwin_ref[0:pad, :] = xwin_ref[TL:TL + pad, :]
            h1_ref[0:pad, :] = h1_ref[TL:TL + pad, :]


def temporal_block_forward(x, params, *, kernel_size, dilation,
                           compute_dtype=jnp.bfloat16, time_tile=512):
    """x: (N, C_in, L) float32 (PyTorch NCW). Returns (N, C_out, L) float32."""
    w1, b1, w2, b2, wd, bd = params
    N, Cin, L = x.shape
    K = kernel_size
    Cout = w1.shape[2]
    pad = (K - 1) * dilation
    Cout_p = _round_up(Cout, 128)                 # lane-dense output channels
    cd = jnp.dtype(compute_dtype)

    # ---- time tiling: bounded tile (multiple of 8, >= pad); pad L on the right ----
    TL = min(_round_up(time_tile, 8), _round_up(L, 8))
    TL = max(TL, _round_up(max(pad, 1), 8))       # halo carry must fit one tile
    L_pad = _round_up(L, TL)
    nt = L_pad // TL

    # Channels-last; zero-pad time on the right (causal => no effect on [0, L)).
    xt = jnp.transpose(x, (0, 2, 1)).astype(compute_dtype)          # (N, L, Cin)
    if L_pad != L:
        xt = jnp.pad(xt, ((0, 0), (0, L_pad - L), (0, 0)))

    def pad_cout(a):
        return jnp.pad(a, ((0, 0),) * (a.ndim - 1) + ((0, Cout_p - Cout),))

    # Fused conv1 + residual weights: (K*Cin, 2*Cout_p).  The residual columns are
    # zero except on the last tap's Cin rows (last tap slice == current x tile).
    w1_flat = pad_cout(w1).reshape(K * Cin, Cout_p)
    wres = jnp.zeros((K * Cin, Cout_p), jnp.float32)
    wres = wres.at[(K - 1) * Cin:, :].set(pad_cout(wd))
    w1r = jnp.concatenate([w1_flat, wres], axis=1).astype(compute_dtype)

    w2_p = jnp.pad(w2, ((0, 0), (0, Cout_p - Cout), (0, Cout_p - Cout))
                   ).astype(compute_dtype)                           # (K, Cout_p, Cout_p)
    b_p = jnp.concatenate([pad_cout(b1), pad_cout(b2), pad_cout(bd)],
                          axis=0).astype(jnp.float32)                # (3, Cout_p)

    # ---- VMEM budget: generation aware (leave headroom for Mosaic scratch) ----
    def _b(shape, dt):
        n = 1
        for s in shape:
            n *= s
        return n * jnp.dtype(dt).itemsize

    est = (2 * _b((TL, Cin), cd)                   # x tile (double buffered)
           + 2 * _b((TL, Cout_p), cd)              # out tile (double buffered)
           + 2 * _b((K * Cin, 2 * Cout_p), cd)     # fused conv1+res weights
           + 2 * _b((K, Cout_p, Cout_p), cd)       # conv2 weights
           + 2 * _b((3, Cout_p), jnp.float32)      # biases
           + _b((pad + TL, Cin), cd)               # x halo window (scratch)
           + _b((pad + TL, Cout_p), cd)            # h1 halo window (scratch)
           + _b((TL, K * Cin), cd)                 # folded conv1 operand
           + _b((TL, 2 * Cout_p), jnp.float32)     # fused matmul result
           + 3 * _b((TL, Cout_p), jnp.float32))    # h1 / acc / h2+res live f32
    try:
        vmem_cap = int(pltpu.get_tpu_info().vmem_capacity_bytes)
    except Exception:
        vmem_cap = 64 * 2**20                      # conservative fallback (v7x size)
    budget = int(0.78 * vmem_cap)                  # ~50 MiB on v7x, ~100 MiB on v5e/v6e
    vmem_limit = int(min(max(2 * est, 32 * 2**20), budget))

    # Advisory cost estimate so XLA schedules the wrapper transposes around us.
    flops = 2 * N * L_pad * TL * 0 + 2 * N * L_pad * (K * Cin * 2 * Cout_p
                                                      + K * Cout_p * Cout_p)
    bytes_accessed = (N * L_pad * (Cin + Cout_p) * cd.itemsize
                      + (K * Cin * 2 * Cout_p + K * Cout_p * Cout_p) * cd.itemsize
                      + 3 * Cout_p * 4)
    cost = pl.CostEstimate(flops=int(flops), transcendentals=0,
                           bytes_accessed=int(bytes_accessed))

    kernel = functools.partial(temporal_block_kernel, TL=TL, pad=pad, K=K,
                               dilation=dilation, nt=nt)

    out_p = pl.pallas_call(
        kernel,
        out_shape=jax.ShapeDtypeStruct((N, L_pad, Cout_p), compute_dtype),
        grid_spec=pltpu.PrefetchScalarGridSpec(
            num_scalar_prefetch=0,
            grid=(N, nt),
            in_specs=[
                pl.BlockSpec((1, TL, Cin), lambda n, t: (n, t, 0)),          # x
                pl.BlockSpec((K * Cin, 2 * Cout_p), lambda n, t: (0, 0)),    # w1+res
                pl.BlockSpec((K, Cout_p, Cout_p), lambda n, t: (0, 0, 0)),   # w2
                pl.BlockSpec((3, Cout_p), lambda n, t: (0, 0)),              # biases
            ],
            out_specs=pl.BlockSpec((1, TL, Cout_p), lambda n, t: (n, t, 0)),
            scratch_shapes=[
                pltpu.VMEM((pad + TL, Cin), compute_dtype),     # x halo + tile
                pltpu.VMEM((pad + TL, Cout_p), compute_dtype),  # h1 halo + tile
            ]),
        compiler_params=pltpu.CompilerParams(
            dimension_semantics=("parallel", "arbitrary"),
            vmem_limit_bytes=vmem_limit),
        cost_estimate=cost,
    )(xt, w1r, w2_p, b_p)

    out = out_p[:, :L, :Cout].astype(jnp.float32)     # drop lane/time padding, upcast
    return jnp.transpose(out, (0, 2, 1))              # back to (N, Cout, L)


def init_params(key, n_inputs, n_outputs, kernel_size):
    """Deterministic Kaiming-normal-style init (matches the module's weight shapes)."""
    k1, k2, k3, k4, k5, k6 = jax.random.split(key, 6)
    gain = jnp.sqrt(2.0)

    def kaiming(key, shape, fan_in):
        return gain / jnp.sqrt(fan_in) * jax.random.normal(key, shape, jnp.float32)

    # stored as (K, Cin, Cout) per-tap matrices (PyTorch stores (Cout, Cin, K))
    w1 = kaiming(k1, (kernel_size, n_inputs, n_outputs), n_inputs * kernel_size)
    w2 = kaiming(k2, (kernel_size, n_outputs, n_outputs), n_outputs * kernel_size)
    wd = kaiming(k3, (n_inputs, n_outputs), n_inputs)
    b1 = 0.1 * jax.random.normal(k4, (1, n_outputs), jnp.float32)
    b2 = 0.1 * jax.random.normal(k5, (1, n_outputs), jnp.float32)
    bd = 0.1 * jax.random.normal(k6, (1, n_outputs), jnp.float32)
    return w1, b1, w2, b2, wd, bd


def reference_forward(x, params, *, kernel_size, dilation):
    """Pure-JAX reference reproducing the PyTorch forward (eval mode)."""
    w1, b1, w2, b2, wd, bd = params
    pad = (kernel_size - 1) * dilation
    L = x.shape[2]

    def conv1d(x_ncw, w_kio, b, dil, p):
        w_oih = jnp.transpose(w_kio, (2, 1, 0))          # (Cout, Cin, K)
        y = lax.conv_general_dilated(
            x_ncw, w_oih, window_strides=(1,), padding=[(p, p)],
            rhs_dilation=(dil,), dimension_numbers=('NCH', 'OIH', 'NCH'))
        return y + b[0][None, :, None]

    h = conv1d(x, w1, b1, dilation, pad)[:, :, :L]       # conv1 + chomp1
    h = _leaky(h)
    h = conv1d(h, w2, b2, dilation, pad)[:, :, :L]       # conv2 + chomp2
    h = _leaky(h)
    res = jnp.einsum('ncl,co->nol', x, wd) + bd[0][None, :, None]
    return _leaky(h + res)


if __name__ == "__main__":
    N, Cin, Cout, L = 2, 4, 8, 16
    kernel_size, dilation = 3, 2                 # causal padding = (K-1)*dilation = 4

    key = jax.random.PRNGKey(0)
    kx, kx2, kp = jax.random.split(key, 3)
    x = jax.random.normal(kx, (N, Cin, L), jnp.float32)      # PyTorch NCW input
    params = init_params(kp, Cin, Cout, kernel_size)

    ref = reference_forward(x, params, kernel_size=kernel_size, dilation=dilation)

    # f32 compute: exact semantics of the PyTorch module (eval mode), single time tile.
    out_f32 = temporal_block_forward(x, params, kernel_size=kernel_size,
                                     dilation=dilation, compute_dtype=jnp.float32)
    out_f32 = jax.block_until_ready(out_f32)
    assert out_f32.shape == (N, Cout, L)
    assert jnp.allclose(out_f32, ref, atol=1e-4, rtol=1e-4), "f32 mismatch vs reference"

    # f32, forced multi-tile: exercises the causal halo carry across time tiles.
    out_tiled = temporal_block_forward(x, params, kernel_size=kernel_size,
                                       dilation=dilation, compute_dtype=jnp.float32,
                                       time_tile=8)
    out_tiled = jax.block_until_ready(out_tiled)
    assert jnp.allclose(out_tiled, ref, atol=1e-4, rtol=1e-4), "tiled mismatch vs reference"

    # Ragged sequence length: exercises right-padding of the time axis.
    L2 = 20
    x2 = jax.random.normal(kx2, (N, Cin, L2), jnp.float32)
    ref2 = reference_forward(x2, params, kernel_size=kernel_size, dilation=dilation)
    out_rag = temporal_block_forward(x2, params, kernel_size=kernel_size,
                                     dilation=dilation, compute_dtype=jnp.float32,
                                     time_tile=8)
    out_rag = jax.block_until_ready(out_rag)
    assert out_rag.shape == (N, Cout, L2)
    assert jnp.allclose(out_rag, ref2, atol=1e-4, rtol=1e-4), "ragged-L mismatch vs reference"

    # bf16 MXU operands with f32 accumulation (default fast path), multi-tile.
    out_bf16 = temporal_block_forward(x, params, kernel_size=kernel_size,
                                      dilation=dilation, compute_dtype=jnp.bfloat16,
                                      time_tile=8)
    out_bf16 = jax.block_until_ready(out_bf16)
    assert jnp.allclose(out_bf16, ref, atol=1e-1, rtol=1e-1), "bf16 mismatch vs reference"

    print("KERNEL_OK")
</pallas_src>

<mosaic_0001>
module attributes {stable_mosaic.version = 11 : i64} {
  func.func @temporal_block_kernel(%arg0: i32, %arg1: i32, %arg2: memref<1x16x4xf32, #tpu.memory_space<vmem>>, %arg3: memref<12x256xf32, #tpu.memory_space<vmem>>, %arg4: memref<3x128x128xf32, #tpu.memory_space<vmem>>, %arg5: memref<3x128xf32, #tpu.memory_space<vmem>>, %arg6: memref<1x16x128xf32, #tpu.memory_space<vmem>>, %arg7: memref<20x4xf32, #tpu.memory_space<vmem>>, %arg8: memref<20x128xf32, #tpu.memory_space<vmem>>) attributes {dimension_semantics = [#tpu.dimension_semantics<parallel>, #tpu.dimension_semantics<arbitrary>], iteration_bounds = array<i64: 2, 1>, scalar_prefetch = 0 : i64, scratch_operands = 2 : i64, tpu.core_type = #tpu.core_type<tc>, window_params = [{transform_indices = @transform_0, window_bounds = array<i64: 1, 16, 4>}, {pipeline_mode = #tpu.pipeline_mode<synchronous>, transform_indices = @transform_1, window_bounds = array<i64: 12, 256>}, {pipeline_mode = #tpu.pipeline_mode<synchronous>, transform_indices = @transform_2, window_bounds = array<i64: 3, 128, 128>}, {pipeline_mode = #tpu.pipeline_mode<synchronous>, transform_indices = @transform_3, window_bounds = array<i64: 3, 128>}, {transform_indices = @transform_4, window_bounds = array<i64: 1, 16, 128>}]} {
    %c0_i32 = arith.constant 0 : i32
    %0 = arith.cmpi eq, %arg1, %c0_i32 : i32
    %1 = arith.extui %0 : i1 to i32
    %c0_i32_0 = arith.constant 0 : i32
    %2 = arith.cmpi ne, %1, %c0_i32_0 : i32
    scf.if %2 {
      %cst_41 = arith.constant 0.000000e+00 : f32
      %55 = vector.broadcast %cst_41 : f32 to vector<4x4xf32>
      %c0_42 = arith.constant 0 : index
      %c0_43 = arith.constant 0 : index
      %56 = vector.load %arg7[%c0_42, %c0_43] : memref<20x4xf32, #tpu.memory_space<vmem>>, vector<4x4xf32>
      tpu.vector_store %arg7[%c0_42, %c0_43], %55 {strides = array<i32>} : memref<20x4xf32, #tpu.memory_space<vmem>>, vector<4x4xf32>,
      %cst_44 = arith.constant 0.000000e+00 : f32
      %57 = vector.broadcast %cst_44 : f32 to vector<4x128xf32>
      %c0_45 = arith.constant 0 : index
      %c0_46 = arith.constant 0 : index
      %58 = vector.load %arg8[%c0_45, %c0_46] : memref<20x128xf32, #tpu.memory_space<vmem>>, vector<4x128xf32>
      tpu.vector_store %arg8[%c0_45, %c0_46], %57 {strides = array<i32>} : memref<20x128xf32, #tpu.memory_space<vmem>>, vector<4x128xf32>,
    } else {
    }
    %c0 = arith.constant 0 : index
    %c0_1 = arith.constant 0 : index
    %c0_2 = arith.constant 0 : index
    %3 = vector.load %arg2[%c0, %c0_1, %c0_2] : memref<1x16x4xf32, #tpu.memory_space<vmem>>, vector<1x16x4xf32>
    %4 = vector.shape_cast %3 : vector<1x16x4xf32> to vector<16x4xf32>
    %c4 = arith.constant 4 : index
    %c0_3 = arith.constant 0 : index
    %5 = vector.load %arg7[%c4, %c0_3] : memref<20x4xf32, #tpu.memory_space<vmem>>, vector<16x4xf32>
    tpu.vector_store %arg7[%c4, %c0_3], %4 {strides = array<i32>} : memref<20x4xf32, #tpu.memory_space<vmem>>, vector<16x4xf32>,
    %c0_4 = arith.constant 0 : index
    %c0_5 = arith.constant 0 : index
    %6 = vector.load %arg7[%c0_4, %c0_5] : memref<20x4xf32, #tpu.memory_space<vmem>>, vector<16x4xf32>
    %c2 = arith.constant 2 : index
    %c0_6 = arith.constant 0 : index
    %7 = vector.load %arg7[%c2, %c0_6] : memref<20x4xf32, #tpu.memory_space<vmem>>, vector<16x4xf32>
    %8 = tpu.concatenate %6, %7, %4 in 1 : vector<16x4xf32>, vector<16x4xf32>, vector<16x4xf32> -> vector<16x12xf32>
    %c0_7 = arith.constant 0 : index
    %c0_8 = arith.constant 0 : index
    %9 = vector.load %arg3[%c0_7, %c0_8] : memref<12x256xf32, #tpu.memory_space<vmem>>, vector<12x256xf32>
    %cst = arith.constant dense<0.000000e+00> : vector<16x256xf32>
    %10 = tpu.matmul %8, %9, %cst {dimension_numbers = #tpu.dot_dimension_numbers<[1], [0], [0], [1], [0, 0, 1, 1], [], []>} : vector<16x12xf32>, vector<12x256xf32>, vector<16x256xf32> -> vector<16x256xf32>
    %11 = vector.extract_strided_slice %10 {offsets = [0, 0], sizes = [16, 128], strides = [1, 1]} : vector<16x256xf32> to vector<16x128xf32>
    %c0_9 = arith.constant 0 : index
    %c0_10 = arith.constant 0 : index
    %12 = vector.load %arg5[%c0_9, %c0_10] : memref<3x128xf32, #tpu.memory_space<vmem>>, vector<1x128xf32>
    %13 = vector.broadcast %12 : vector<1x128xf32> to vector<16x128xf32>
    %14 = arith.addf %11, %13 : vector<16x128xf32>
    %cst_11 = arith.constant 0.000000e+00 : f32
    %15 = vector.broadcast %cst_11 : f32 to vector<16x128xf32>
    %16 = arith.cmpf ogt, %14, %15 : vector<16x128xf32>
    %cst_12 = arith.constant 1.000000e-01 : f32
    %17 = vector.broadcast %cst_12 : f32 to vector<16x128xf32>
    %18 = arith.mulf %17, %14 : vector<16x128xf32>
    %19 = arith.select %16, %14, %18 : vector<16x128xi1>, vector<16x128xf32>
    %20 = vector.extract_strided_slice %10 {offsets = [0, 128], sizes = [16, 128], strides = [1, 1]} : vector<16x256xf32> to vector<16x128xf32>
    %c2_13 = arith.constant 2 : index
    %c0_14 = arith.constant 0 : index
    %21 = vector.load %arg5[%c2_13, %c0_14] : memref<3x128xf32, #tpu.memory_space<vmem>>, vector<1x128xf32>
    %22 = vector.broadcast %21 : vector<1x128xf32> to vector<16x128xf32>
    %23 = arith.addf %20, %22 : vector<16x128xf32>
    %c4_15 = arith.constant 4 : index
    %c0_16 = arith.constant 0 : index
    %24 = vector.load %arg8[%c4_15, %c0_16] : memref<20x128xf32, #tpu.memory_space<vmem>>, vector<16x128xf32>
    tpu.vector_store %arg8[%c4_15, %c0_16], %19 {strides = array<i32>} : memref<20x128xf32, #tpu.memory_space<vmem>>, vector<16x128xf32>,
    %c2_17 = arith.constant 2 : index
    %c0_18 = arith.constant 0 : index
    %c0_19 = arith.constant 0 : index
    %25 = vector.load %arg4[%c2_17, %c0_18, %c0_19] : memref<3x128x128xf32, #tpu.memory_space<vmem>>, vector<1x128x128xf32>
    %26 = vector.shape_cast %25 : vector<1x128x128xf32> to vector<128x128xf32>
    %cst_20 = arith.constant dense<0.000000e+00> : vector<16x128xf32>
    %27 = tpu.matmul %19, %26, %cst_20 {dimension_numbers = #tpu.dot_dimension_numbers<[1], [0], [0], [1], [0, 0, 1, 1], [], []>} : vector<16x128xf32>, vector<128x128xf32>, vector<16x128xf32> -> vector<16x128xf32>
    %c0_21 = arith.constant 0 : index
    %c0_22 = arith.constant 0 : index
    %28 = vector.load %arg8[%c0_21, %c0_22] : memref<20x128xf32, #tpu.memory_space<vmem>>, vector<16x128xf32>
    %c0_23 = arith.constant 0 : index
    %c0_24 = arith.constant 0 : index
    %c0_25 = arith.constant 0 : index
    %29 = vector.load %arg4[%c0_23, %c0_24, %c0_25] : memref<3x128x128xf32, #tpu.memory_space<vmem>>, vector<1x128x128xf32>
    %30 = vector.shape_cast %29 : vector<1x128x128xf32> to vector<128x128xf32>
    %cst_26 = arith.constant dense<0.000000e+00> : vector<16x128xf32>
    %31 = tpu.matmul %28, %30, %cst_26 {dimension_numbers = #tpu.dot_dimension_numbers<[1], [0], [0], [1], [0, 0, 1, 1], [], []>} : vector<16x128xf32>, vector<128x128xf32>, vector<16x128xf32> -> vector<16x128xf32>
    %32 = arith.addf %27, %31 : vector<16x128xf32>
    %c2_27 = arith.constant 2 : index
    %c0_28 = arith.constant 0 : index
    %33 = vector.load %arg8[%c2_27, %c0_28] : memref<20x128xf32, #tpu.memory_space<vmem>>, vector<16x128xf32>
    %c1 = arith.constant 1 : index
    %c0_29 = arith.constant 0 : index
    %c0_30 = arith.constant 0 : index
    %34 = vector.load %arg4[%c1, %c0_29, %c0_30] : memref<3x128x128xf32, #tpu.memory_space<vmem>>, vector<1x128x128xf32>
    %35 = vector.shape_cast %34 : vector<1x128x128xf32> to vector<128x128xf32>
    %cst_31 = arith.constant dense<0.000000e+00> : vector<16x128xf32>
    %36 = tpu.matmul %33, %35, %cst_31 {dimension_numbers = #tpu.dot_dimension_numbers<[1], [0], [0], [1], [0, 0, 1, 1], [], []>} : vector<16x128xf32>, vector<128x128xf32>, vector<16x128xf32> -> vector<16x128xf32>
    %37 = arith.addf %32, %36 : vector<16x128xf32>
    %c1_32 = arith.constant 1 : index
    %c0_33 = arith.constant 0 : index
    %38 = vector.load %arg5[%c1_32, %c0_33] : memref<3x128xf32, #tpu.memory_space<vmem>>, vector<1x128xf32>
    %39 = vector.broadcast %38 : vector<1x128xf32> to vector<16x128xf32>
    %40 = arith.addf %37, %39 : vector<16x128xf32>
    %cst_34 = arith.constant 0.000000e+00 : f32
    %41 = vector.broadcast %cst_34 : f32 to vector<16x128xf32>
    %42 = arith.cmpf ogt, %40, %41 : vector<16x128xf32>
    %cst_35 = arith.constant 1.000000e-01 : f32
    %43 = vector.broadcast %cst_35 : f32 to vector<16x128xf32>
    %44 = arith.mulf %43, %40 : vector<16x128xf32>
    %45 = arith.select %42, %40, %44 : vector<16x128xi1>, vector<16x128xf32>
    %46 = arith.addf %45, %23 : vector<16x128xf32>
    %cst_36 = arith.constant 0.000000e+00 : f32
    %47 = vector.broadcast %cst_36 : f32 to vector<16x128xf32>
    %48 = arith.cmpf ogt, %46, %47 : vector<16x128xf32>
    %cst_37 = arith.constant 1.000000e-01 : f32
    %49 = vector.broadcast %cst_37 : f32 to vector<16x128xf32>
    %50 = arith.mulf %49, %46 : vector<16x128xf32>
    %51 = arith.select %48, %46, %50 : vector<16x128xi1>, vector<16x128xf32>
    %c0_38 = arith.constant 0 : index
    %c0_39 = arith.constant 0 : index
    %c0_40 = arith.constant 0 : index
    %52 = vector.load %arg6[%c0_38, %c0_39, %c0_40] : memref<1x16x128xf32, #tpu.memory_space<vmem>>, vector<1x16x128xf32>
    %53 = vector.shape_cast %52 : vector<1x16x128xf32> to vector<16x128xf32>
    %54 = vector.shape_cast %51 : vector<16x128xf32> to vector<1x16x128xf32>
    tpu.vector_store %arg6[%c0_38, %c0_39, %c0_40], %54 {strides = array<i32>} : memref<1x16x128xf32, #tpu.memory_space<vmem>>, vector<1x16x128xf32>,
    return
  }
  func.func @transform_0(%arg0: i32, %arg1: i32) -> (i32, i32, i32) {
    %c0_i32 = arith.constant 0 : i32
    %c0_i32_0 = arith.constant 0 : i32
    return %arg0, %arg1, %c0_i32 : i32, i32, i32
  }
  func.func @transform_1(%arg0: i32, %arg1: i32) -> (i32, i32) {
    %c0_i32 = arith.constant 0 : i32
    %c0_i32_0 = arith.constant 0 : i32
    %c0_i32_1 = arith.constant 0 : i32
    return %c0_i32, %c0_i32_0 : i32, i32
  }
  func.func @transform_2(%arg0: i32, %arg1: i32) -> (i32, i32, i32) {
    %c0_i32 = arith.constant 0 : i32
    %c0_i32_0 = arith.constant 0 : i32
    %c0_i32_1 = arith.constant 0 : i32
    %c0_i32_2 = arith.constant 0 : i32
    return %c0_i32, %c0_i32_0, %c0_i32_1 : i32, i32, i32
  }
  func.func @transform_3(%arg0: i32, %arg1: i32) -> (i32, i32) {
    %c0_i32 = arith.constant 0 : i32
    %c0_i32_0 = arith.constant 0 : i32
    %c0_i32_1 = arith.constant 0 : i32
    return %c0_i32, %c0_i32_0 : i32, i32
  }
  func.func @transform_4(%arg0: i32, %arg1: i32) -> (i32, i32, i32) {
    %c0_i32 = arith.constant 0 : i32
    %c0_i32_0 = arith.constant 0 : i32
    return %arg0, %arg1, %c0_i32 : i32, i32, i32
  }
}

</mosaic_0001>

<bundles_post_ra>
// kernel: tpu_custom_call.1
= control target key start
LH: loop header
LB: loop body
LE: loop exit
PB: predicated region body
PF: predicated region fallthrough
CT: control target
= control target key end

     0   :  { %9 = vsyncpa [#allocation5], 0  ;;  %s1514_s0 = inlined_call_operand.vmem [shape: f32[2,16,4], index: 0, kind: input, shape index: {}]   ;;  %s1515_s1 = inlined_call_operand.vmem [shape: f32[12,256], index: 1, kind: input, shape index: {}]   ;;  %s1516_s2 = inlined_call_operand.hbm [shape: f32[3,128,128], index: 2, kind: input, shape index: {}]   ;;  %s1517_s3 = inlined_call_operand.vmem [shape: f32[3,128], index: 3, kind: input, shape index: {}]   ;;  %s1518_s4 = inlined_call_operand.hbm [shape: f32[2,16,128], index: 4, kind: output, shape index: {}]  }
   0x1   :  { %10 = vsyncpa [#allocation6], 0 }
   0x2   :  { %12 = vsyncpa [#allocation6 + $0x1], 0  ;;  %s1315_s15 = smov 0   ;;  %s1317_s16 = smov 0  }
   0x3   :  { %s1319_s17 = smov 0   ;;  %s1321_s18 = smov 0  }
   0x4   :  { %s1323_s19 = smov 0   ;;  %s1325_s20 = smov 0  }
   0x5 LB: > { %s807_s21 = sadd.s32 4294967295, %s1279_s20   ;;  %s808_s22 = sadd.s32 4294967294, %s1279_s20   ;;  %s1279_s20 = sphi %s1325_s20, %s18_s20   ;;  %s1275_s19 = sphi %s1323_s19, %s1536_s19   ;;  %s1271_s18 = sphi %s1321_s18, %s1535_s18   ;;  %s1267_s17 = sphi %s1319_s17, %s1534_s17   ;;  %s1263_s16 = sphi %s1317_s16, %s1533_s16   ;;  %s1259_s15 = sphi %s1315_s15, %s1532_s15  }
   0x6   : > { %s30_s23 = sadd.s32 1, %s1275_s19  ;;  %s130_s24 = sadd.s32 1, %s1267_s17 }
   0x7   : > { %p32_p0 = scmp.ge.s32.totalorder %s30_s23, 2  ;;  %p140_p1 = scmp.ne.s32.totalorder %s1267_s17, %s1263_s16 }
   0x8   : > { %p141_p2 = scmp.eq.s32.totalorder %s807_s21, 1  ;;  %p146_p3 = scmp.ne.s32.totalorder %s1263_s16, %s1259_s15 }
   0x9   : > { %s1538_s23 = smov (%p32_p0, %s30_s23), 0  ;;  %p147_p5 = scmp.eq.s32.totalorder %s808_s22, 1 }
   0xa   : > { %p1355_p4 = por %p141_p2, %p140_p1  ;;  %s125_s26 = ssub.s32 %s1275_s19, %s1538_s23 }
   0xb   : > { %p809_p6 = scmp.ge.s32.totalorder %s1279_s20, 1  ;;  %p128_p7 = scmp.eq.s32.totalorder %s125_s26, 0 }
   0xc   : > { %s1523_s25 = scalar_select %p1355_p4, 1, 0 }
   0xd   : > { %p1362_p8 = por %p147_p5, %p146_p3  ;;  %p154_p9 = scmp.lt.s32.totalorder %s1279_s20, 3 }
   0xe   : > { %s1368_s28 = scalar_select %p128_p7, %s1267_s17, %s130_s24  }
   0xf   : > { %s1524_s27 = scalar_select %p1362_p8, 1, 0 }
  0x10   : > { %p1370_p10 = pnand %p809_p6, %p154_p9  ;;  %p1374_p11 = scmp.eq.s32.totalorder %s807_s21, 0 }
  0x11   : > { %s1281_s5 = smov [#allocation4]   ;;  %s1169_s10 = scalar_lea.hbm %s1516_s2, 6144 }
  0x12   : > { %s1525_s29 = scalar_select %p1370_p10, 1, 0 }
  0x13   : > { %s1526_s30 = scalar_select %p1374_p11, 1, 0 }
  0x14   : > { %p1102_p12 = pneg %p1370_p10  ;;  %s169_s6 = sshll.u32 %s1281_s5, 4  ;;  %s170_s6 = int_to_ptr.vmem [resolvable:$true] %s169_s6 }
  0x15   : > { %p1170_p0 = scmp.ne.s32.totalorder %s1516_s2, %s1169_s10  ;;  %p1176_p5 = scmp.lt.u32.totalorder %s1169_s10, %s1516_s2 }
  0x16   : > { %p1382_p13 = pnand %p1374_p11, %p1102_p12 }
  0x18   : > { %p1171_p1 = pneg %p1382_p13 }
  0x1a   : > { %p1172_p2 = pnand %p1171_p1, %p1170_p0 }
  0x1c   : > { %p1173_p3 = pneg %p1172_p2 }
  0x1e   : > { %p1178_p6 = pnand %p1176_p5, %p1173_p3 }
  0x20   : > { %1181 = shalt.err (!%p1178_p6)
}
  0x21   : > { %s1182_s21 = scalar_lea.vmem %s170_s6, 6144  ;;  %p1190_p8 = scmp.lt.s32.totalorder %s170_s6, %s170_s6 }
  0x22   : > { %p1183_p7 = scmp.ne.s32.totalorder %s170_s6, %s1182_s21  ;;  %p1191_p4 = scmp.lt.s32.totalorder %s1182_s21, %s1182_s21 }
  0x24   : > { %p1185_p9 = pnand %p1183_p7, %p1171_p1  ;;  %p1192_p11 = por %p1191_p4, %p1190_p8 }
  0x26   : > { %p1186_p12 = pneg %p1185_p9 }
  0x28   : > { %p1193_p10 = pnand %p1192_p11, %p1186_p12 }
  0x2a   : > { %1196 = shalt.err (!%p1193_p10)
}
  0x2b   : > { %s1282_s22 = smov 128   ;;  %s1283_s24 = smov 8  }
  0x2c   : > { %1105 = dma.hbm_to_vmem [thread:$0]  (!%p1382_p13), %s1516_s2, 6144, %s170_s6, [#allocation5], %s1282_s22, %s1282_s22, %s1283_s24  }
  0x2d   : > { %p1528_p0 = scmp.ne.s32.totalorder %s1525_s29, 0 }
  0x2e   : > { %p1529_p2 = scmp.ne.s32.totalorder (!%p1528_p0), %s1526_s30, 0 }
  0x2f   : > { %201 = sbr.rel (%p1528_p0) target bundleno = 683 (0x2ab), region = 36 }
  0x36   : > { %1250 = dma.done.wait (%p1529_p2), [#allocation5], 6144  }
  0x37   : > { %1252 = vsyncadd (%p1529_p2), [#allocation5], 4294961152  ;;  %p232_p4 = scmp.lt.s32.totalorder %s1271_s18, 1  ;;  %vm246_vm0 = vcmask 27648   ;;  %v1284_v0 = vmov 0.0   ;;  %vm290_vm1 = vcmask 1043456  }
  0x38   : > { %247 = vst.msk [vmem:[#allocation2] sm:$0xf] %vm246_vm0, %v1284_v0  ;;  %248 = vst [vmem:[#allocation3] sm:$0xf] %v1284_v0  ;;  %361 = vmatprep.mubr.f32.mxu0 %v1284_v0  ;;  %vm251_vm2 = vcmask 31744   ;;  %vm1285_vm3 = vmmov 1  }
  0x39   : > { %s233_s6 = scalar_select %p232_p4, %s1271_s18, 1  ;;  %vm991_vm4 = vmpackc.low %vm290_vm1, %vm1285_vm3  ;;  %v280_v3 = vld [vmem:[%s1515_s1 + $0x8] sm:$0xff]  ;;  %v282_v4 = vld [vmem:[%s1515_s1 + $0x18] sm:$0xf]  ;;  %vm276_vm5 = vcmask 64512   ;;  %vm283_vm6 = vcmask 97280  }
  0x3a   : > { %v279_v5 = vld [vmem:[%s1515_s1] sm:$0xff]  ;;  %v281_v6 = vld [vmem:[%s1515_s1 + $0x10] sm:$0xf]  ;;  %v990_v7 = vpack.c.bf16 %v282_v4, %v280_v3  ;;  %v398_v10 = vld [vmem:[#allocation4 + $0x108] sm:$0xff]  ;;  %s1286_s24 = smov 4   ;;  %s1287_s26 = smov 8  }
  0x3b   : > { %s829_s29 = sshll.u32 %s233_s6, 4  ;;  %v993_v8 = vpack.c.bf16 %v281_v6, %v279_v5  ;;  %v397_v9 = vld [vmem:[#allocation4 + $0x100] sm:$0xff]  ;;  %v399_v11 = vld [vmem:[#allocation4 + $0x110] sm:$0xff]  ;;  %v400_v13 = vld [vmem:[#allocation4 + $0x118] sm:$0xff]  ;;  %s830_s11 = sshll.u32 %s1271_s18, 8 }
  0x3c   : > { %s239_s9 = scalar_lea.vmem %s1514_s0, %s829_s29  ;;  %992 = vmatprep.subr.msk.bf16.mxu0 %vm991_vm4, %v990_v7  ;;  %v1028_v12 = vpack.c.bf16 %v398_v10, %v397_v9  ;;  %v1032_v14 = vpack.c.bf16 %v400_v13, %v399_v11  ;;  %v401_v15 = vld [vmem:[#allocation4 + $0x120] sm:$0xff]  ;;  %v416_v17 = vld [vmem:[#allocation4 + $0x8] sm:$0xff]  ;;  %v403_v23 = vld [vmem:[#allocation4 + $0x130] sm:$0xff]  ;;  %s228_s29 = sand.u32 1, %s1263_s16  }
  0x3d   : > { %v249_v1 = vld [vmem:[%s239_s9] sm:$0xff]  ;;  %v250_v2 = vld [vmem:[%s239_s9 + $0x8] sm:$0xff]  ;;  %995 = vmatpush1.bf16.msk.msra.mxu0 %vm991_vm4, %v993_v8  ;;  %v415_v16 = vld [vmem:[#allocation4] sm:$0xff]  ;;  %s814_s9 = sshll.u32 %s228_s29, 4  ;;  %s1461_s22 = scalar_lea.hbm %s1518_s4, %s830_s11 }
  0x3e   : > { %252 = vst.msk [vmem:[#allocation2 + $0x4] sm:$0xff] %vm251_vm2, %v249_v1  ;;  %253 = vst.msk [vmem:[#allocation2 + $0xc] sm:$0xff] %vm251_vm2, %v250_v2  ;;  %1029 = vmatprep.subr.bf16.mxu1 %v1028_v12  ;;  %v402_v20 = vld [vmem:[#allocation4 + $0x128] sm:$0xff]  ;;  %v996_v21 = vpack.c.bf16 %v416_v17, %v415_v16  ;;  %v404_v24 = vld [vmem:[#allocation4 + $0x138] sm:$0xff]  ;;  %s230_s12 = scalar_lea.vmem [#allocation7], %s814_s9  ;;  %s1467_s18 = scalar_lea.sflag [#allocation6], %s228_s29 }
  0x3f   : > { %1031 = vmatpush3.bf16.msra.mxu1 %v1028_v12  ;;  %v1036_v22 = vpack.c.bf16 %v402_v20, %v401_v15  ;;  %v1040_v25 = vpack.c.bf16 %v404_v24, %v403_v23  ;;  %v405_v26 = vld [vmem:[#allocation4 + $0x140] sm:$0xff]  ;;  %v406_v27 = vld [vmem:[#allocation4 + $0x148] sm:$0xff]  ;;  %v407_v29 = vld [vmem:[#allocation4 + $0x150] sm:$0xff]  ;;  %s716_s13 = sshll.u32 %s230_s12, 4  ;;  %p1530_p10 = scmp.ne.s32.totalorder %s1523_s25, 0  ;;  %s1463_s13 = int_to_ptr.vmem [resolvable:$true] %s716_s13 }
  0x40   : > { %997 = vmatprep.subr.bf16.mxu0 %v996_v21  ;;  %1033 = vmatprep.subr.bf16.mxu1 %v1032_v14  ;;  %v1044_v28 = vpack.c.bf16 %v406_v27, %v405_v26  ;;  %v408_v30 = vld [vmem:[#allocation4 + $0x158] sm:$0xff]  ;;  %v417_v35 = vld [vmem:[#allocation4 + $0x10] sm:$0xff]  ;;  %v419_v42 = vld [vmem:[#allocation4 + $0x20] sm:$0xff]  ;;  %s1288_s5 = smov [#allocation7]  }
  0x41   : > { %v1048_v31 = vpack.c.bf16 %v408_v30, %v407_v29  ;;  %v418_v36 = vld [vmem:[#allocation4 + $0x18] sm:$0xff]  ;;  %v420_v43 = vld [vmem:[#allocation4 + $0x28] sm:$0xff]  ;;  %v421_v48 = vld [vmem:[#allocation4 + $0x30] sm:$0xff]  ;;  %s1201_s6 = sshll.u32 %s1288_s5, 4  ;;  %s1202_s6 = int_to_ptr.vmem [resolvable:$false] %s1201_s6 }
  0x42   : > { %v1000_v40 = vpack.c.bf16 %v418_v36, %v417_v35  ;;  %v1004_v46 = vpack.c.bf16 %v420_v43, %v419_v42  ;;  %v422_v49 = vld [vmem:[#allocation4 + $0x38] sm:$0xff]  ;;  %v409_v51 = vld [vmem:[#allocation4 + $0x160] sm:$0xff]  ;;  %v410_v52 = vld [vmem:[#allocation4 + $0x168] sm:$0xff]  ;;  %s1203_s7 = scalar_lea.vmem %s1202_s6, 512  ;;  %p1204_p1 = scmp.lt.s32.totalorder %s1463_s13, %s1202_s6 }
  0x43   : > { %1035 = vmatpush3.bf16.msra.mxu1 %v1032_v14  ;;  %v1008_v50 = vpack.c.bf16 %v422_v49, %v421_v48  ;;  %v1052_v53 = vpack.c.bf16 %v410_v52, %v409_v51  ;;  %v423_v54 = vld [vmem:[#allocation4 + $0x40] sm:$0xff]  ;;  %v424_v55 = vld [vmem:[#allocation4 + $0x48] sm:$0xff]  ;;  %v411_v57 = vld [vmem:[#allocation4 + $0x170] sm:$0xff] }
  0x44   : > { %1037 = vmatprep.subr.bf16.mxu1 %v1036_v22  ;;  %v1012_v56 = vpack.c.bf16 %v424_v55, %v423_v54  ;;  %v412_v58 = vld [vmem:[#allocation4 + $0x178] sm:$0xff]  ;;  %v425_v60 = vld [vmem:[#allocation4 + $0x50] sm:$0xff]  ;;  %v584_v63 = vld [vmem:[#allocation4 + $0x80] sm:$0xff] }
  0x45   : > { %v256_v18 = vld [vmem:[#allocation2 + $0x2] sm:$0xff]  ;;  %v257_v19 = vld [vmem:[#allocation2 + $0xa] sm:$0xff]  ;;  %v1056_v59 = vpack.c.bf16 %v412_v58, %v411_v57  ;;  %v428_v3 = vld [vmem:[#allocation4 + $0x68] sm:$0xff] }
  0x46   : > { %260 = vrot.lane.b32.xlu0 %v256_v18, %s1286_s24  ;;  %262 = vrot.lane.b32.xlu1 %v257_v19, %s1286_s24  ;;  %v254_v34 = vld [vmem:[#allocation2] sm:$0xff]  ;;  %v255_v37 = vld [vmem:[#allocation2 + $0x8] sm:$0xff]  ;;  %v589_v23 = vld [vmem:[#allocation4 + $0xa8] sm:$0xff]  ;;  %s1197_s24 = scalar_lea.vmem %s1463_s13, 256 }
  0x47   : > { %1039 = vmatpush3.bf16.msra.mxu1 %v1036_v22  ;;  %v426_v61 = vld [vmem:[#allocation4 + $0x58] sm:$0xff]  ;;  %v429_v5 = vld [vmem:[#allocation4 + $0x70] sm:$0xff]  ;;  %v588_v22 = vld [vmem:[#allocation4 + $0xa0] sm:$0xff]  ;;  %p1198_p8 = scmp.ne.s32.totalorder %s1463_s13, %s1197_s24  ;;  %p1205_p3 = scmp.lt.s32.totalorder %s1203_s7, %s1197_s24 }
  0x48   : > { %1041 = vmatprep.subr.bf16.mxu1 %v1040_v25  ;;  %v1016_v62 = vpack.c.bf16 %v426_v61, %v425_v60  ;;  %v430_v6 = vld [vmem:[#allocation4 + $0x78] sm:$0xff]  ;;  %v821_v8 = vld [vmem:[%s1517_s3] ss:$0 sm:$0xff]  ;;  %v1068_v24 = vpack.c.bf16 %v589_v23, %v588_v22  ;;  %v822_v52 = vld [vmem:[%s1517_s3 + $0x2] ss:$0 sm:$0xff] }
  0x49   : > { %v1024_v7 = vpack.c.bf16 %v430_v6, %v429_v5  ;;  %v586_v17 = vld [vmem:[#allocation4 + $0x90] sm:$0xff]  ;;  %v587_v18 = vld [vmem:[#allocation4 + $0x98] sm:$0xff]  ;;  %p1199_p11 = pnand %p1198_p8, %p1530_p10  ;;  %p1206_p5 = por %p1205_p3, %p1204_p1 }
  0x4a   : > { %268 = vrot.lane.b32.xlu0 %v249_v1, %s1287_s26  ;;  %270 = vrot.lane.b32.xlu1 %v250_v2, %s1287_s26  ;;  %v427_v2 = vld [vmem:[#allocation4 + $0x60] sm:$0xff]  ;;  %v1064_v20 = vpack.c.bf16 %v587_v18, %v586_v17  ;;  %v595_v35 = vld [vmem:[#allocation4 + $0xd8] sm:$0xff] }
  0x4b   : > { %1043 = vmatpush3.bf16.msra.mxu1 %v1040_v25  ;;  %v1020_v4 = vpack.c.bf16 %v428_v3, %v427_v2  ;;  %v590_v25 = vld [vmem:[#allocation4 + $0xb0] sm:$0xff]  ;;  %p1200_p13 = pneg %p1199_p11 }
  0x4c   : > { %1045 = vmatprep.subr.bf16.mxu1 %v1044_v28 }
  0x4d   : > { %p1207_p6 = pnand %p1206_p5, %p1200_p13 }
  0x4f   : > { %1047 = vmatpush3.bf16.msra.mxu1 %v1044_v28  ;;  %v591_v28 = vld [vmem:[#allocation4 + $0xb8] sm:$0xff] }
  0x50   : > { %1049 = vmatprep.subr.bf16.mxu1 %v1048_v31  ;;  %v1072_v29 = vpack.c.bf16 %v591_v28, %v590_v25 }
  0x53   : > { %1051 = vmatpush3.bf16.msra.mxu1 %v1048_v31  ;;  %v592_v31 = vld [vmem:[#allocation4 + $0xc0] sm:$0xff] }
  0x54   : > { %1053 = vmatprep.subr.bf16.mxu1 %v1052_v53 }
  0x57   : > { %1055 = vmatpush3.bf16.msra.mxu1 %v1052_v53 }
  0x58   : > { %1057 = vmatprep.subr.bf16.mxu1 %v1056_v59 }
  0x5b   : > { %1059 = vmatpush3.bf16.msra.mxu1 %v1056_v59 }
  0xb8   : > { %v261_v32 = vpop.permute.xlu0 %260  ;;  %v263_v33 = vpop.permute.xlu1 %262 }
  0xb9   : > { %v274_v38 = vsel %vm251_vm2, %v254_v34, %v261_v32  ;;  %v275_v44 = vsel %vm251_vm2, %v255_v37, %v263_v33  ;;  %v593_v32 = vld [vmem:[#allocation4 + $0xc8] sm:$0xff]  ;;  %v594_v34 = vld [vmem:[#allocation4 + $0xd0] sm:$0xff]  ;;  %v596_v37 = vld [vmem:[#allocation4 + $0xe0] sm:$0xff] }
  0xba   : > { %v1076_v33 = vpack.c.bf16 %v593_v32, %v592_v31  ;;  %v1080_v36 = vpack.c.bf16 %v595_v35, %v594_v34 }
  0xbc   : > { %v269_v39 = vpop.permute.xlu0 %268  ;;  %v271_v45 = vpop.permute.xlu1 %270 }
  0xbd   : > { %v277_v41 = vsel %vm276_vm5, %v274_v38, %v269_v39  ;;  %v278_v47 = vsel %vm276_vm5, %v275_v44, %v271_v45  ;;  %v597_v38 = vld [vmem:[#allocation4 + $0xe8] sm:$0xff] }
  0xbe   : > { %819 = vmatmul.mubr.msk.f32.vlgmr.msra.gmra.mrb[0].mxu0 %vm283_vm6, %v277_v41  ;;  %v1084_v39 = vpack.c.bf16 %v597_v38, %v596_v37  ;;  %v599_v41 = vld [vmem:[#allocation4 + $0xf8] sm:$0xff] }
  0xbf   : > { %367 = vmatprep.mubr.f32.mxu0 %v1284_v0  ;;  %999 = vmatpush3.bf16.msra.mxu0 %v996_v21  ;;  %v585_v0 = vld [vmem:[#allocation4 + $0x88] sm:$0xff] }
  0xc0   : > { %1001 = vmatprep.subr.bf16.mxu0 %v1000_v40  ;;  %v1060_v1 = vpack.c.bf16 %v585_v0, %v584_v63 }
  0xc2   : > { %820 = vmatmul.mubr.msk.f32.gmra.mrb[2].mxu0 %vm283_vm6, %v278_v47  ;;  %1061 = vmatprep.subr.bf16.mxu1 %v1060_v1  ;;  %v823_v47 = vld [vmem:[%s1517_s3 + $0x1] ss:$0 sm:$0xff] }
  0xc3   : > { %1003 = vmatpush3.bf16.msra.mxu0 %v1000_v40  ;;  %v598_v40 = vld [vmem:[#allocation4 + $0xf0] sm:$0xff] }
  0xc4   : > { %1005 = vmatprep.subr.bf16.mxu0 %v1004_v46  ;;  %v1088_v42 = vpack.c.bf16 %v599_v41, %v598_v40 }
  0xc7   : > { %1007 = vmatpush3.bf16.msra.mxu0 %v1004_v46 }
  0xc8   : > { %1009 = vmatprep.subr.bf16.mxu0 %v1008_v50 }
  0xcb   : > { %1011 = vmatpush3.bf16.msra.mxu0 %v1008_v50 }
  0xcc   : > { %1013 = vmatprep.subr.bf16.mxu0 %v1012_v56 }
  0xcf   : > { %1015 = vmatpush3.bf16.msra.mxu0 %v1012_v56 }
  0xd0   : > { %1017 = vmatprep.subr.bf16.mxu0 %v1016_v62 }
  0xd3   : > { %1019 = vmatpush3.bf16.msra.mxu0 %v1016_v62 }
  0xd4   : > { %1021 = vmatprep.subr.bf16.mxu0 %v1020_v4 }
  0xd7   : > { %1023 = vmatpush3.bf16.msra.mxu0 %v1020_v4 }
  0xd8   : > { %1025 = vmatprep.subr.bf16.mxu0 %v1024_v7 }
  0xdb   : > { %1027 = vmatpush3.bf16.msra.mxu0 %v1024_v7 }
 0x191   : > { %v363_v9 = vpop.f32.mrb[0].mxu0 }
 0x192   : > { %v379_v10 = vadd.f32 %v821_v8, %v363_v9  ;;  %v1442_v11 = vpop.f32.mrb[1].mxu0 }
 0x193   : > { %v392_v57 = vadd.f32 %v822_v52, %v1442_v11 }
 0x194   : > { %vm381_vm7 = vcmp.gt.f32.partialorder %v379_v10, 0.0  ;;  %v383_v12 = vmul.f32 0.1, %v379_v10 }
 0x195   : > { %v369_v13 = vpop.f32.mrb[2].mxu0 }
 0x196   : > { %v380_v14 = vadd.f32 %v821_v8, %v369_v13  ;;  %v1444_v15 = vpop.f32.mrb[3].mxu0  ;;  %v385_v16 = vsel %vm381_vm7, %v379_v10, %v383_v12 }
 0x197   : > { %394 = vst [vmem:[#allocation3 + $0x4] sm:$0xff] %v385_v16  ;;  %952 = vmatprep.mubr.f32.mxu1 %v385_v16  ;;  %v393_v55 = vadd.f32 %v822_v52, %v1444_v15 }
 0x198   : > { %v384_v19 = vmul.f32 0.1, %v380_v14  ;;  %vm382_vm8 = vcmp.gt.f32.partialorder %v380_v14, 0.0 }
 0x19a   : > { %v386_v21 = vsel %vm382_vm8, %v380_v14, %v384_v19 }
 0x19b   : > { %395 = vst [vmem:[#allocation3 + $0xc] sm:$0xff] %v386_v21  ;;  %953 = vmatmul.mubr.f32.vlgmr.msra.gmra.mrb[0].mxu1 %v386_v21 }
 0x19c   : > { %1063 = vmatpush3.bf16.msra.mxu1 %v1060_v1 }
 0x19d   : > { %1065 = vmatprep.subr.bf16.mxu1 %v1064_v20 }
 0x19e   : > { %v413_v26 = vld [vmem:[#allocation3] sm:$0xff] }
 0x19f   : > { %v581_v27 = vld [vmem:[#allocation3 + $0x2] sm:$0xff]  ;;  %917 = vmatprep.mubr.f32.mxu0 %v413_v26 }
 0x1a0   : > { %987 = vmatprep.mubr.f32.mxu1 %v581_v27  ;;  %1067 = vmatpush3.bf16.msra.mxu1 %v1064_v20 }
 0x1a1   : > { %1069 = vmatprep.subr.bf16.mxu1 %v1068_v24 }
 0x1a2   : > { %v414_v30 = vld [vmem:[#allocation3 + $0x8] sm:$0xff] }
 0x1a3   : > { %918 = vmatmul.mubr.f32.vlgmr.msra.gmra.mrb[4].mxu0 %v414_v30  ;;  %v582_v43 = vld [vmem:[#allocation3 + $0xa] sm:$0xff] }
 0x1a4   : > { %1071 = vmatpush3.bf16.msra.mxu1 %v1068_v24 }
 0x1a5   : > { %1073 = vmatprep.subr.bf16.mxu1 %v1072_v29 }
 0x1a8   : > { %1075 = vmatpush3.bf16.msra.mxu1 %v1072_v29 }
 0x1a9   : > { %1077 = vmatprep.subr.bf16.mxu1 %v1076_v33 }
 0x1ac   : > { %1079 = vmatpush3.bf16.msra.mxu1 %v1076_v33 }
 0x1ad   : > { %1081 = vmatprep.subr.bf16.mxu1 %v1080_v36 }
 0x1b0   : > { %1083 = vmatpush3.bf16.msra.mxu1 %v1080_v36 }
 0x1b1   : > { %1085 = vmatprep.subr.bf16.mxu1 %v1084_v39 }
 0x1b4   : > { %1087 = vmatpush3.bf16.msra.mxu1 %v1084_v39 }
 0x1b5   : > { %1089 = vmatprep.subr.bf16.mxu1 %v1088_v42 }
 0x1b8   : > { %1091 = vmatpush3.bf16.msra.mxu1 %v1088_v42 }
 0x1bb   : > { %988 = vmatmul.mubr.f32.vlgmr.msra.gmra.mrb[0].mxu1 %v582_v43 }
 0x276   : > { %v919_v44 = vpop.f32.mrb[4].mxu0 }
 0x277   : > { %v497_v45 = vpop.f32.mrb[5].mxu0 }
 0x28e   : > { %v989_v46 = vpop.f32.mrb[0].mxu1 }
 0x28f   : > { %v1092_v48 = vadd.f32 %v989_v46, %v919_v44  ;;  %v666_v49 = vpop.f32.mrb[1].mxu1 }
 0x290   : > { %v1093_v50 = vadd.f32 %v666_v49, %v497_v45 }
 0x291   : > { %v683_v51 = vadd.f32 %v1092_v48, %v823_v47 }
 0x292   : > { %v682_v53 = vadd.f32 %v1093_v50, %v823_v47 }
 0x293   : > { %vm685_vm9 = vcmp.gt.f32.partialorder %v683_v51, 0.0  ;;  %v687_v54 = vmul.f32 0.1, %v683_v51 }
 0x294   : > { %vm684_vm10 = vcmp.gt.f32.partialorder %v682_v53, 0.0  ;;  %v686_v56 = vmul.f32 0.1, %v682_v53 }
 0x295   : > { %v689_v58 = vsel %vm685_vm9, %v683_v51, %v687_v54 }
 0x296   : > { %v691_v59 = vadd.f32 %v689_v58, %v393_v55  ;;  %v688_v60 = vsel %vm684_vm10, %v682_v53, %v686_v56 }
 0x297   : > { %v690_v61 = vadd.f32 %v688_v60, %v392_v57 }
 0x298   : > { %vm693_vm11 = vcmp.gt.f32.partialorder %v691_v59, 0.0  ;;  %v695_v62 = vmul.f32 0.1, %v691_v59 }
 0x299   : > { %vm692_vm12 = vcmp.gt.f32.partialorder %v690_v61, 0.0  ;;  %v694_v63 = vmul.f32 0.1, %v690_v61 }
 0x29a   : > { %v697_v0 = vsel %vm693_vm11, %v691_v59, %v695_v62 }
 0x29b   : > { %699 = vst [vmem:[%s230_s12 + $0x8] sm:$0xff] %v697_v0  ;;  %v696_v1 = vsel %vm692_vm12, %v690_v61, %v694_v63 }
 0x29c   : > { %698 = vst [vmem:[%s230_s12] sm:$0xff] %v696_v1 }
 0x29d   : > { %1210 = shalt.err (!%p1207_p6)
}
 0x29e   : > { %s1211_s29 = scalar_lea.hbm %s1461_s22, 256  ;;  %s1215_s30 = scalar_lea.hbm %s1518_s4, 512 }
 0x29f   : > { %p1212_p7 = scmp.ne.s32.totalorder %s1461_s22, %s1211_s29  ;;  %p1216_p0 = scmp.lt.u32.totalorder %s1461_s22, %s1518_s4 }
 0x2a0   : > { %p1217_p2 = scmp.lt.u32.totalorder %s1215_s30, %s1211_s29  ;;  %p1219_p8 = scmp.lt.u32.totalorder %s1211_s29, %s1461_s22 }
 0x2a1   : > { %p1213_p9 = pnand %p1212_p7, %p1530_p10 }
 0x2a2   : > { %p1218_p4 = por %p1217_p2, %p1216_p0 }
 0x2a3   : > { %p1214_p12 = pneg %p1213_p9 }
 0x2a4   : > { %p1220_p11 = por %p1219_p8, %p1218_p4 }
 0x2a6   : > { %p1221_p13 = pnand %p1220_p11, %p1214_p12 }
 0x2a8   : > { %1224 = shalt.err (!%p1221_p13)
}
 0x2a9   : > { %s1289_s12 = smov 128  }
 0x2aa   : > { %1100 = dma.vmem_to_hbm [thread:$0]  (%p1530_p10), %s1463_s13, 256, %s1461_s22, %s1467_s18, %s1289_s12, %s1289_s12, %s1287_s26  }
 0x2ab PF: > { %p1112_p1 = scmp.ge.s32.totalorder %s1279_s20, 2  ;;  %s731_s14 = sand.u32 1, %s1259_s15  }
 0x2ac   : > { %p1531_p3 = scmp.ne.s32.totalorder %s1524_s27, 0  ;;  %s732_s21 = scalar_lea.sflag [#allocation6], %s731_s14 }
 0x2ae   : > { %p1107_p5 = pnand %p1112_p1, %p1531_p3 }
 0x2b0   : > { %1254 = dma.done.wait (!%p1107_p5), %s732_s21, 256  }
 0x2b1   : > { %1256 = vsyncadd (!%p1107_p5), %s732_s21, 4294967040  ;;  %s18_s20 = sadd.s32 1, %s1279_s20   ;;  %s1532_s15 = smov %s1263_s16 }
 0x2b2   : > { %p15_p6 = scmp.ge.s32.totalorder %s18_s20, 4   ;;  %s1533_s16 = smov %s1267_s17 }
 0x2b3   : > { %s1534_s17 = smov %s1368_s28  ;;  %s1535_s18 = smov %s1275_s19 }
 0x2b4   : > { %s1536_s19 = smov %s1538_s23  ;;  %17 = sbr.rel (!%p15_p6) target bundleno = 5 (0x5), region = 82 }
 0x2bb   :  { %737 = vsyncpa [#allocation5], 1 }
 0x2bc   :  { %739 = vsyncpa [#allocation5 + $0x1], 1 }
 0x2bd   :  { %740 = vsyncpa [#allocation6], 1 }
 0x2be   :  { %742 = vsyncpa [#allocation6 + $0x1], 1 }

</bundles_post_ra>
